<compile_context>
chip_gen: v5e
topology: v5e:2x2
jax: 0.10.0
libtpu: 0.0.40
codegen_flags: <defaults>
</compile_context>

<pallas_src>
import functools

import jax
import jax.numpy as jnp
from jax.experimental import pallas as pl
from jax.experimental.pallas import tpu as pltpu

NEG_BIG = -10000000000.0  # matches masked_fill value in the torch module


# --------------------------------------------------------------------------- #
# hardware model helpers
# --------------------------------------------------------------------------- #
def _vmem_capacity_bytes():
    try:
        return int(pltpu.get_tpu_info().vmem_capacity_bytes)
    except Exception:
        return 128 * 1024 * 1024  # v5e/v6e default


def _vmem_limit_bytes():
    # v5e/v6e: 128 MiB physical -> request 64 MiB (plenty of headroom).
    # v7x:      64 MiB physical -> request 48 MiB (never the whole VMEM).
    cap = _vmem_capacity_bytes()
    return int(min(3 * cap // 4, 64 * 1024 * 1024))


def _supports_bf16_eup():
    # bf16 EUP/VPU path exists on v6e/v7x; not on v5e (or older). Be conservative.
    try:
        kind = jax.devices()[0].device_kind.lower()
    except Exception:
        return False
    for bad in ("v2", "v3", "v4", "v5"):
        if bad in kind:
            return False
    return True


# --------------------------------------------------------------------------- #
# tile pickers (VMEM byte model, double-buffering included)
# --------------------------------------------------------------------------- #
def _pick_tiles_attn(B, Lq, Lk, Dk, Dv, in_isz, out_isz, has_mask, budget):
    """(batch tile, query tile) for the full-attn path (K/V resident, full Lk)."""

    def step_bytes(bt, tq):
        b = 2 * bt * tq * Dk * in_isz          # q block (double-buffered)
        b += 2 * bt * Lk * Dk * in_isz         # K block (resident per batch tile)
        b += 2 * bt * Lk * Dv * in_isz         # V block
        b += 2 * bt * tq * Dv * out_isz        # output block
        b += 2 * bt * tq * Lk * out_isz        # attn output block (dominant)
        if has_mask:
            b += 2 * bt * tq * Lk              # int8 mask block
        b += 3 * bt * tq * Lk * 4              # f32 scores / exp intermediates
        return b

    if Lq <= 512:
        tq_candidates = [Lq] + [t for t in (512, 256, 128, 64, 32, 16, 8) if t < Lq]
    else:
        tq_candidates = [512, 256, 128, 64, 32, 16, 8]

    for tq in tq_candidates:
        per_one = step_bytes(1, tq)
        if per_one <= budget:
            bt = int(min(B, max(1, budget // per_one)))
            return bt, tq
    # TODO(synk): for Lk so long that even (BT=1, TQ=8) full-Lk blocks blow the
    # budget, the attn-returning path needs an Lk-tiled two-pass scheme; use
    # return_attn=False (flash path) instead for such shapes.
    return 1, tq_candidates[-1]


def _pick_kv_tile(Lk):
    if Lk <= 2048:
        return Lk
    for cand in (1024, 512, 256, 128):
        if Lk % cand == 0:
            return cand
    return Lk  # cannot tile safely without padded-key masking


def _pick_tiles_flash(B, Lq, Lk, Dk, Dv, in_isz, out_isz, has_mask, budget):
    """(batch tile, query tile, kv tile) for the no-attn flash path."""
    tk = _pick_kv_tile(Lk)

    def step_bytes(bt, tq):
        b = 2 * bt * tq * Dk * in_isz          # q block
        b += 2 * bt * tk * Dk * in_isz         # K tile
        b += 2 * bt * tk * Dv * in_isz         # V tile
        b += 2 * bt * tq * Dv * out_isz        # output block
        if has_mask:
            b += 2 * bt * tq * tk              # int8 mask tile
        b += 3 * bt * tq * tk * 4              # f32 scores / p intermediates
        b += bt * tq * (2 * 4 + 4 * Dv)        # m/l/acc f32 scratch
        return b

    if Lq <= 512:
        tq_candidates = [Lq] + [t for t in (512, 256, 128, 64, 32, 16, 8) if t < Lq]
    else:
        tq_candidates = [512, 256, 128, 64, 32, 16, 8]

    for tq in tq_candidates:
        per_one = step_bytes(1, tq)
        if per_one <= budget:
            bt = int(min(B, max(1, budget // per_one)))
            return bt, tq, tk
    return 1, tq_candidates[-1], tk


# --------------------------------------------------------------------------- #
# kernel bodies
# --------------------------------------------------------------------------- #
def _softmax_and_store(scores, v, out_ref, attn_ref, exp_dtype):
    """Row softmax over the last axis of `scores` (f32), store attn and attn@v."""
    m = jnp.max(scores, axis=-1, keepdims=True)
    centered = scores - m
    if exp_dtype != jnp.float32:
        centered = centered.astype(exp_dtype)      # bf16 EUP exp on v6e/v7x
    e = jnp.exp(centered)
    denom = jnp.sum(e, axis=-1, keepdims=True, dtype=jnp.float32)
    inv = pl.reciprocal(denom, approx=True)        # EUP vrcp, off the VALU slot
    attn = e * inv.astype(e.dtype)

    # Single cast to the low-precision output dtype, reused for the AV matmul.
    attn_lp = attn.astype(attn_ref.dtype)
    attn_ref[...] = attn_lp
    av = attn_lp if attn_ref.dtype == v.dtype else attn.astype(v.dtype)
    out_ref[...] = jnp.einsum(
        "bqk,bkd->bqd", av, v, preferred_element_type=jnp.float32
    ).astype(out_ref.dtype)


def _attn_kernel_nomask(q_ref, k_ref, v_ref, out_ref, attn_ref, *,
                        inv_temperature, exp_dtype):
    q = q_ref[...] * jnp.asarray(inv_temperature, dtype=q_ref.dtype)
    scores = jnp.einsum("bqd,bkd->bqk", q, k_ref[...],
                        preferred_element_type=jnp.float32)
    _softmax_and_store(scores, v_ref[...], out_ref, attn_ref, exp_dtype)


def _attn_kernel_mask(q_ref, k_ref, v_ref, mask_ref, out_ref, attn_ref, *,
                      inv_temperature, exp_dtype):
    q = q_ref[...] * jnp.asarray(inv_temperature, dtype=q_ref.dtype)
    scores = jnp.einsum("bqd,bkd->bqk", q, k_ref[...],
                        preferred_element_type=jnp.float32)
    # int8 compared directly — no int8->f32 convert pass over the score block.
    scores = jnp.where(mask_ref[...] != 0, jnp.float32(NEG_BIG), scores)
    _softmax_and_store(scores, v_ref[...], out_ref, attn_ref, exp_dtype)


def _flash_update(scores, v, m_sc, l_sc, acc_sc, exp_dtype):
    m_prev = m_sc[...]
    m_new = jnp.maximum(m_prev, jnp.max(scores, axis=-1, keepdims=True))
    alpha = jnp.exp(m_prev - m_new)
    centered = scores - m_new
    if exp_dtype != jnp.float32:
        centered = centered.astype(exp_dtype)
    p = jnp.exp(centered)
    l_sc[...] = alpha * l_sc[...] + jnp.sum(p, axis=-1, keepdims=True,
                                            dtype=jnp.float32)
    acc_sc[...] = alpha * acc_sc[...] + jnp.einsum(
        "bqk,bkd->bqd", p.astype(v.dtype), v, preferred_element_type=jnp.float32)
    m_sc[...] = m_new


def _flash_kernel_nomask(q_ref, k_ref, v_ref, out_ref, m_sc, l_sc, acc_sc, *,
                         inv_temperature, exp_dtype):
    kv = pl.program_id(2)

    @pl.when(kv == 0)
    def _():
        m_sc[...] = jnp.full(m_sc.shape, -jnp.inf, dtype=m_sc.dtype)
        l_sc[...] = jnp.zeros(l_sc.shape, dtype=l_sc.dtype)
        acc_sc[...] = jnp.zeros(acc_sc.shape, dtype=acc_sc.dtype)

    q = q_ref[...] * jnp.asarray(inv_temperature, dtype=q_ref.dtype)
    scores = jnp.einsum("bqd,bkd->bqk", q, k_ref[...],
                        preferred_element_type=jnp.float32)
    _flash_update(scores, v_ref[...], m_sc, l_sc, acc_sc, exp_dtype)

    @pl.when(kv == pl.num_programs(2) - 1)
    def _():
        out_ref[...] = (acc_sc[...] *
                        pl.reciprocal(l_sc[...], approx=True)).astype(out_ref.dtype)


def _flash_kernel_mask(q_ref, k_ref, v_ref, mask_ref, out_ref,
                       m_sc, l_sc, acc_sc, *, inv_temperature, exp_dtype):
    kv = pl.program_id(2)

    @pl.when(kv == 0)
    def _():
        m_sc[...] = jnp.full(m_sc.shape, -jnp.inf, dtype=m_sc.dtype)
        l_sc[...] = jnp.zeros(l_sc.shape, dtype=l_sc.dtype)
        acc_sc[...] = jnp.zeros(acc_sc.shape, dtype=acc_sc.dtype)

    q = q_ref[...] * jnp.asarray(inv_temperature, dtype=q_ref.dtype)
    scores = jnp.einsum("bqd,bkd->bqk", q, k_ref[...],
                        preferred_element_type=jnp.float32)
    scores = jnp.where(mask_ref[...] != 0, jnp.float32(NEG_BIG), scores)
    _flash_update(scores, v_ref[...], m_sc, l_sc, acc_sc, exp_dtype)

    @pl.when(kv == pl.num_programs(2) - 1)
    def _():
        out_ref[...] = (acc_sc[...] *
                        pl.reciprocal(l_sc[...], approx=True)).astype(out_ref.dtype)


# --------------------------------------------------------------------------- #
# wrapper
# --------------------------------------------------------------------------- #
def scaled_dot_product_attention(q, k, v, temperature, mask=None, *, return_attn=True):
    """Pallas implementation of torch ScaledDotProductAttention.forward.

    q: (B, Lq, Dk), k: (B, Lk, Dk), v: (B, Lk, Dv)
    mask: optional (B, Lq, Lk) bool/int array (True => fill with -1e10)

    return_attn=True  -> (output, attn), matching the torch module.
    return_attn=False -> output only, via a flash-style kernel that never
                         materializes the (B, Lq, Lk) probabilities in HBM
                         (the attn write-back is the HBM roofline).
    Edge blocks (B % BT or Lq % TQ != 0) read padded query rows; softmax is
    row-wise and those rows are never written back, so this is benign.
    """
    B, Lq, Dk = q.shape
    _, Lk, Dv = v.shape
    assert k.shape == (B, Lk, Dk)
    if mask is not None:
        mask = jnp.asarray(mask)
        assert mask.shape == (B, Lq, Lk)

    in_isz = jnp.dtype(q.dtype).itemsize
    out_isz = in_isz
    vmem_limit = _vmem_limit_bytes()
    budget = (3 * vmem_limit) // 4
    inv_temperature = 1.0 / float(temperature)
    exp_dtype = (jnp.bfloat16
                 if (q.dtype == jnp.bfloat16 and _supports_bf16_eup())
                 else jnp.float32)

    # TODO(synk): nn.Dropout(0.1) on attn — identity in eval mode; training-mode
    # torch-RNG dropout stream is not reproduced.
    # TODO(synk): if a real workload has Lk or Dv far below 128 (masked partial
    # stores), pad the last dim to 128 in the wrapper (with key masking) for
    # lane-dense stores and slice after the call.

    if return_attn:
        BT, TQ = _pick_tiles_attn(B, Lq, Lk, Dk, Dv, in_isz, out_isz,
                                  mask is not None, budget)
        grid = (pl.cdiv(B, BT), pl.cdiv(Lq, TQ))
        out_shape = (
            jax.ShapeDtypeStruct((B, Lq, Dv), q.dtype),
            jax.ShapeDtypeStruct((B, Lq, Lk), q.dtype),  # attn in input dtype
        )
        out_specs = (
            pl.BlockSpec((BT, TQ, Dv), lambda b, qi: (b, qi, 0)),
            pl.BlockSpec((BT, TQ, Lk), lambda b, qi: (b, qi, 0)),
        )
        # K/V return the same block index across the q-tile axis -> VMEM
        # resident while all query tiles of a batch tile are processed.
        in_specs = [
            pl.BlockSpec((BT, TQ, Dk), lambda b, qi: (b, qi, 0)),
            pl.BlockSpec((BT, Lk, Dk), lambda b, qi: (b, 0, 0)),
            pl.BlockSpec((BT, Lk, Dv), lambda b, qi: (b, 0, 0)),
        ]
        cparams = pltpu.CompilerParams(
            # batch axis parallel (v7x 2-TC split lands here), q axis arbitrary
            # so K/V residency is preserved per core.
            dimension_semantics=("parallel", "arbitrary"),
            vmem_limit_bytes=vmem_limit,
        )
        if mask is None:
            kernel = functools.partial(_attn_kernel_nomask,
                                       inv_temperature=inv_temperature,
                                       exp_dtype=exp_dtype)
            return pl.pallas_call(
                kernel,
                out_shape=out_shape,
                grid_spec=pltpu.PrefetchScalarGridSpec(
                    num_scalar_prefetch=0, grid=grid,
                    in_specs=in_specs, out_specs=out_specs),
                compiler_params=cparams,
            )(q, k, v)
        else:
            mask_i8 = mask.astype(jnp.int8)
            kernel = functools.partial(_attn_kernel_mask,
                                       inv_temperature=inv_temperature,
                                       exp_dtype=exp_dtype)
            return pl.pallas_call(
                kernel,
                out_shape=out_shape,
                grid_spec=pltpu.PrefetchScalarGridSpec(
                    num_scalar_prefetch=0, grid=grid,
                    in_specs=in_specs + [
                        pl.BlockSpec((BT, TQ, Lk), lambda b, qi: (b, qi, 0))],
                    out_specs=out_specs),
                compiler_params=cparams,
            )(q, k, v, mask_i8)

    # ---------------- no-attn fast path: flash-style, Lk-tiled ----------------
    BT, TQ, TK = _pick_tiles_flash(B, Lq, Lk, Dk, Dv, in_isz, out_isz,
                                   mask is not None, budget)
    grid = (pl.cdiv(B, BT), pl.cdiv(Lq, TQ), pl.cdiv(Lk, TK))
    out_shape = jax.ShapeDtypeStruct((B, Lq, Dv), q.dtype)
    out_specs = pl.BlockSpec((BT, TQ, Dv), lambda b, qi, ki: (b, qi, 0))
    in_specs = [
        pl.BlockSpec((BT, TQ, Dk), lambda b, qi, ki: (b, qi, 0)),
        pl.BlockSpec((BT, TK, Dk), lambda b, qi, ki: (b, ki, 0)),
        pl.BlockSpec((BT, TK, Dv), lambda b, qi, ki: (b, ki, 0)),
    ]
    scratch = [
        pltpu.VMEM((BT, TQ, 1), jnp.float32),   # m
        pltpu.VMEM((BT, TQ, 1), jnp.float32),   # l
        pltpu.VMEM((BT, TQ, Dv), jnp.float32),  # acc
    ]
    cparams = pltpu.CompilerParams(
        dimension_semantics=("parallel", "arbitrary", "arbitrary"),
        vmem_limit_bytes=vmem_limit,
    )
    if mask is None:
        kernel = functools.partial(_flash_kernel_nomask,
                                   inv_temperature=inv_temperature,
                                   exp_dtype=exp_dtype)
        return pl.pallas_call(
            kernel,
            out_shape=out_shape,
            grid_spec=pltpu.PrefetchScalarGridSpec(
                num_scalar_prefetch=0, grid=grid,
                in_specs=in_specs, out_specs=out_specs,
                scratch_shapes=scratch),
            compiler_params=cparams,
        )(q, k, v)
    else:
        mask_i8 = mask.astype(jnp.int8)
        kernel = functools.partial(_flash_kernel_mask,
                                   inv_temperature=inv_temperature,
                                   exp_dtype=exp_dtype)
        return pl.pallas_call(
            kernel,
            out_shape=out_shape,
            grid_spec=pltpu.PrefetchScalarGridSpec(
                num_scalar_prefetch=0, grid=grid,
                in_specs=in_specs + [
                    pl.BlockSpec((BT, TQ, TK), lambda b, qi, ki: (b, qi, ki))],
                out_specs=out_specs,
                scratch_shapes=scratch),
            compiler_params=cparams,
        )(q, k, v, mask_i8)


# --------------------------------------------------------------------------- #
# reference & self-test
# --------------------------------------------------------------------------- #
def _reference(q, k, v, temperature, mask=None):
    attn = jnp.einsum("bqd,bkd->bqk", q.astype(jnp.float32),
                      k.astype(jnp.float32)) / temperature
    if mask is not None:
        attn = jnp.where(mask, NEG_BIG, attn)
    attn = jax.nn.softmax(attn, axis=2)
    out = jnp.einsum("bqk,bkd->bqd", attn, v.astype(jnp.float32))
    return out, attn


if __name__ == "__main__":
    # small shapes consistent with the module: batch=2, seq=8, d_k=d_v=32
    B, Lq, Lk, Dk, Dv = 2, 8, 8, 32, 32
    temperature = float(Dk) ** 0.5  # canonical sqrt(d_k) temperature

    key = jax.random.PRNGKey(0)
    kq, kk, kv, km = jax.random.split(key, 4)
    q = jax.random.normal(kq, (B, Lq, Dk), dtype=jnp.float32)
    k = jax.random.normal(kk, (B, Lk, Dk), dtype=jnp.float32)
    v = jax.random.normal(kv, (B, Lk, Dv), dtype=jnp.float32)
    mask = jax.random.bernoulli(km, p=0.3, shape=(B, Lq, Lk))

    # --- unmasked path (full torch-parity: output + attn) ---
    out, attn = scaled_dot_product_attention(q, k, v, temperature, mask=None)
    out = jax.block_until_ready(out)
    attn = jax.block_until_ready(attn)
    ref_out, ref_attn = _reference(q, k, v, temperature, mask=None)
    assert out.shape == (B, Lq, Dv) and attn.shape == (B, Lq, Lk)
    assert jnp.allclose(out, ref_out, atol=2e-3, rtol=2e-3)
    assert jnp.allclose(attn, ref_attn, atol=1e-3, rtol=2e-3)

    # --- masked path ---
    out_m, attn_m = scaled_dot_product_attention(q, k, v, temperature, mask=mask)
    out_m = jax.block_until_ready(out_m)
    attn_m = jax.block_until_ready(attn_m)
    ref_out_m, ref_attn_m = _reference(q, k, v, temperature, mask=mask)
    assert jnp.allclose(out_m, ref_out_m, atol=2e-3, rtol=2e-3)
    assert jnp.allclose(attn_m, ref_attn_m, atol=1e-3, rtol=2e-3)

    # --- no-attn fast path (flash-style, Lk-tiled) ---
    out_f = scaled_dot_product_attention(q, k, v, temperature, mask=None,
                                         return_attn=False)
    out_f = jax.block_until_ready(out_f)
    assert jnp.allclose(out_f, ref_out, atol=2e-3, rtol=2e-3)

    out_fm = scaled_dot_product_attention(q, k, v, temperature, mask=mask,
                                          return_attn=False)
    out_fm = jax.block_until_ready(out_fm)
    assert jnp.allclose(out_fm, ref_out_m, atol=2e-3, rtol=2e-3)

    print("KERNEL_OK")
</pallas_src>

<mosaic_0001>
module attributes {stable_mosaic.version = 11 : i64} {
  func.func @_attn_kernel_nomask(%arg0: i32, %arg1: i32, %arg2: memref<2x8x32xf32, #tpu.memory_space<vmem>>, %arg3: memref<2x8x32xf32, #tpu.memory_space<vmem>>, %arg4: memref<2x8x32xf32, #tpu.memory_space<vmem>>, %arg5: memref<2x8x32xf32, #tpu.memory_space<vmem>>, %arg6: memref<2x8x8xf32, #tpu.memory_space<vmem>>) attributes {dimension_semantics = [#tpu.dimension_semantics<parallel>, #tpu.dimension_semantics<arbitrary>], iteration_bounds = array<i64: 1, 1>, scalar_prefetch = 0 : i64, scratch_operands = 0 : i64, tpu.core_type = #tpu.core_type<tc>, window_params = [{transform_indices = @transform_0, window_bounds = array<i64: 2, 8, 32>}, {transform_indices = @transform_1, window_bounds = array<i64: 2, 8, 32>}, {transform_indices = @transform_2, window_bounds = array<i64: 2, 8, 32>}, {transform_indices = @transform_3, window_bounds = array<i64: 2, 8, 32>}, {transform_indices = @transform_4, window_bounds = array<i64: 2, 8, 8>}]} {
    %c0 = arith.constant 0 : index
    %c0_0 = arith.constant 0 : index
    %c0_1 = arith.constant 0 : index
    %0 = vector.load %arg2[%c0, %c0_0, %c0_1] : memref<2x8x32xf32, #tpu.memory_space<vmem>>, vector<2x8x32xf32>
    %cst = arith.constant 0.176776692 : f32
    %1 = vector.broadcast %cst : f32 to vector<2x8x32xf32>
    %2 = arith.mulf %0, %1 : vector<2x8x32xf32>
    %c0_2 = arith.constant 0 : index
    %c0_3 = arith.constant 0 : index
    %c0_4 = arith.constant 0 : index
    %3 = vector.load %arg3[%c0_2, %c0_3, %c0_4] : memref<2x8x32xf32, #tpu.memory_space<vmem>>, vector<2x8x32xf32>
    "tpu.trace_start"() <{level = 10 : i32, message = "bqd,bkd->bqk"}> : () -> ()
    %cst_5 = arith.constant dense<0.000000e+00> : vector<2x8x8xf32>
    %4 = tpu.matmul %2, %3, %cst_5 {dimension_numbers = #tpu.dot_dimension_numbers<[2], [2], [1], [1], [0, 0, 0, 1, 1, 1], [0], [0]>} : vector<2x8x32xf32>, vector<2x8x32xf32>, vector<2x8x8xf32> -> vector<2x8x8xf32>
    "tpu.trace_stop"() : () -> ()
    %c0_6 = arith.constant 0 : index
    %c0_7 = arith.constant 0 : index
    %c0_8 = arith.constant 0 : index
    %5 = vector.load %arg4[%c0_6, %c0_7, %c0_8] : memref<2x8x32xf32, #tpu.memory_space<vmem>>, vector<2x8x32xf32>
    %cst_9 = arith.constant dense<0xFF800000> : vector<2x8xf32>
    %6 = vector.multi_reduction <maximumf>, %4, %cst_9 [2] : vector<2x8x8xf32> to vector<2x8xf32>
    %7 = vector.shape_cast %6 : vector<2x8xf32> to vector<2x8x1xf32>
    %8 = vector.broadcast %7 : vector<2x8x1xf32> to vector<2x8x8xf32>
    %9 = arith.subf %4, %8 : vector<2x8x8xf32>
    %10 = math.exp %9 : vector<2x8x8xf32>
    %cst_10 = arith.constant dense<0.000000e+00> : vector<2x8xf32>
    %11 = vector.multi_reduction <add>, %10, %cst_10 [2] : vector<2x8x8xf32> to vector<2x8xf32>
    %12 = vector.shape_cast %11 : vector<2x8xf32> to vector<2x8x1xf32>
    %13 = tpu.reciprocal %12 {approx = true} : vector<2x8x1xf32> -> vector<2x8x1xf32>
    %14 = vector.broadcast %13 : vector<2x8x1xf32> to vector<2x8x8xf32>
    %15 = arith.mulf %10, %14 : vector<2x8x8xf32>
    %c0_11 = arith.constant 0 : index
    %c0_12 = arith.constant 0 : index
    %c0_13 = arith.constant 0 : index
    %16 = vector.load %arg6[%c0_11, %c0_12, %c0_13] : memref<2x8x8xf32, #tpu.memory_space<vmem>>, vector<2x8x8xf32>
    tpu.vector_store %arg6[%c0_11, %c0_12, %c0_13], %15 {strides = array<i32>} : memref<2x8x8xf32, #tpu.memory_space<vmem>>, vector<2x8x8xf32>,
    "tpu.trace_start"() <{level = 10 : i32, message = "bqk,bkd->bqd"}> : () -> ()
    %cst_14 = arith.constant dense<0.000000e+00> : vector<2x8x32xf32>
    %17 = tpu.matmul %15, %5, %cst_14 {dimension_numbers = #tpu.dot_dimension_numbers<[2], [1], [1], [2], [0, 0, 0, 1, 1, 2], [0], [0]>} : vector<2x8x8xf32>, vector<2x8x32xf32>, vector<2x8x32xf32> -> vector<2x8x32xf32>
    "tpu.trace_stop"() : () -> ()
    %c0_15 = arith.constant 0 : index
    %c0_16 = arith.constant 0 : index
    %c0_17 = arith.constant 0 : index
    %18 = vector.load %arg5[%c0_15, %c0_16, %c0_17] : memref<2x8x32xf32, #tpu.memory_space<vmem>>, vector<2x8x32xf32>
    tpu.vector_store %arg5[%c0_15, %c0_16, %c0_17], %17 {strides = array<i32>} : memref<2x8x32xf32, #tpu.memory_space<vmem>>, vector<2x8x32xf32>,
    return
  }
  func.func @transform_0(%arg0: i32, %arg1: i32) -> (i32, i32, i32) {
    %c0_i32 = arith.constant 0 : i32
    %c0_i32_0 = arith.constant 0 : i32
    return %arg0, %arg1, %c0_i32 : i32, i32, i32
  }
  func.func @transform_1(%arg0: i32, %arg1: i32) -> (i32, i32, i32) {
    %c0_i32 = arith.constant 0 : i32
    %c0_i32_0 = arith.constant 0 : i32
    %c0_i32_1 = arith.constant 0 : i32
    return %arg0, %c0_i32, %c0_i32_0 : i32, i32, i32
  }
  func.func @transform_2(%arg0: i32, %arg1: i32) -> (i32, i32, i32) {
    %c0_i32 = arith.constant 0 : i32
    %c0_i32_0 = arith.constant 0 : i32
    %c0_i32_1 = arith.constant 0 : i32
    return %arg0, %c0_i32, %c0_i32_0 : i32, i32, i32
  }
  func.func @transform_3(%arg0: i32, %arg1: i32) -> (i32, i32, i32) {
    %c0_i32 = arith.constant 0 : i32
    %c0_i32_0 = arith.constant 0 : i32
    return %arg0, %arg1, %c0_i32 : i32, i32, i32
  }
  func.func @transform_4(%arg0: i32, %arg1: i32) -> (i32, i32, i32) {
    %c0_i32 = arith.constant 0 : i32
    %c0_i32_0 = arith.constant 0 : i32
    return %arg0, %arg1, %c0_i32 : i32, i32, i32
  }
}

</mosaic_0001>

<bundles_post_ra>
// kernel: tpu_custom_call.1
= control target key start
LH: loop header
LB: loop body
LE: loop exit
PB: predicated region body
PF: predicated region fallthrough
CT: control target
= control target key end

     0   :  { %10 = vsyncpa [#allocation3], 0  ;;  %s462_s0 = inlined_call_operand.hbm [shape: f32[2,8,32], index: 0, kind: input, shape index: {}]   ;;  %s463_s1 = inlined_call_operand.hbm [shape: f32[2,8,32], index: 1, kind: input, shape index: {}]   ;;  %s464_s2 = inlined_call_operand.hbm [shape: f32[2,8,32], index: 2, kind: input, shape index: {}]   ;;  %s465_s3 = inlined_call_operand.hbm [shape: f32[2,8,32], index: 3, kind: output, shape index: {0}]   ;;  %s466_s4 = inlined_call_operand.hbm [shape: f32[2,8,8], index: 4, kind: output, shape index: {1}]  }
   0x1   :  { %11 = vsyncpa [#allocation6], 0 }
   0x2   :  { %12 = vsyncpa [#allocation4], 0 }
   0x3   :  { %13 = vsyncpa [#allocation10], 0  ;;  %s31_s17 = sshll.u32 %s463_s1, 4  ;;  %s386_s18 = smov [#allocation5]   ;;  %s32_s17 = int_to_ptr.hbm [resolvable:$true] %s31_s17 }
   0x4   :  { %s33_s19 = sshll.u32 %s386_s18, 4  ;;  %s18_s22 = sshll.u32 %s462_s0, 4  ;;  %s34_s19 = int_to_ptr.vmem [resolvable:$true] %s33_s19  ;;  %s19_s22 = int_to_ptr.hbm [resolvable:$true] %s18_s22 }
   0x5   :  { %s387_s23 = smov 128   ;;  %s388_s24 = smov 8  }
   0x6   :  { %39 = dma.hbm_to_vmem [thread:$0]  %s32_s17, 256, %s34_s19, [#allocation6], %s387_s23, %s387_s23, %s388_s24  }
   0x7   :  { %s389_s25 = smov [#allocation2]   ;;  %s44_s1 = sshll.u32 %s464_s2, 4  ;;  %s45_s1 = int_to_ptr.hbm [resolvable:$true] %s44_s1 }
   0x8   :  { %s20_s26 = sshll.u32 %s389_s25, 4  ;;  %s390_s0 = smov [#allocation7]   ;;  %s21_s26 = int_to_ptr.vmem [resolvable:$true] %s20_s26 }
   0x9   :  { %26 = dma.hbm_to_vmem [thread:$0]  %s19_s22, 256, %s21_s26, [#allocation3], %s387_s23, %s387_s23, %s388_s24  }
   0xa   :  { %s46_s29 = sshll.u32 %s390_s0, 4  ;;  %s47_s29 = int_to_ptr.vmem [resolvable:$true] %s46_s29 }
   0xb   :  { %52 = dma.hbm_to_vmem [thread:$0]  %s45_s1, 256, %s47_s29, [#allocation6], %s387_s23, %s387_s23, %s388_s24  }
   0xc   :  { %378 = dma.done.wait [#allocation3], 256  }
   0xd   :  { %379 = vsyncadd [#allocation3], 4294967040 }
   0xe   :  { %380 = dma.done.wait [#allocation6], 512  }
   0xf   :  { %381 = vsyncadd [#allocation6], 4294966784  ;;  %vm71_vm0 = vcmask 261120   ;;  %v69_v0 = vld [vmem:[#allocation5] sm:$0xff]  ;;  %v65_v1 = vld [vmem:[#allocation2] sm:$0xff]  ;;  %vm126_vm1 = vcmask 64512  }
  0x10   :  { %v70_v2 = vld [vmem:[#allocation5 + $0x8] sm:$0xff]  ;;  %237 = vmatpush.xpose.msk.msra.mxu0 %vm71_vm0, %v69_v0  ;;  %v67_v3 = vmul.f32 0.17677669, %v65_v1  ;;  %v66_v4 = vld [vmem:[#allocation2 + $0x8] sm:$0xff]  ;;  %v124_v20 = vld [vmem:[#allocation7] sm:$0xff]  ;;  %s391_s2 = smov [#allocation9]  }
  0x11   :  { %239 = vmatpush.xpose.msk.msra.mxu1 %vm71_vm0, %v70_v2  ;;  %v68_v5 = vmul.f32 0.17677669, %v66_v4  ;;  %169 = vmatpush.msra.mxu2 %v124_v20  ;;  %v125_v21 = vld [vmem:[#allocation7 + $0x8] sm:$0xff]  ;;  %s216_s30 = sshll.u32 %s391_s2, 4  ;;  %s218_s7 = sshll.u32 %s466_s4, 4  ;;  %s217_s30 = int_to_ptr.vmem [resolvable:$true] %s216_s30  ;;  %s219_s7 = int_to_ptr.hbm [resolvable:$true] %s218_s7 }
  0x12   :  { %192 = vmatpush.msra.mxu3 %v125_v21  ;;  %s392_s8 = smov [#allocation8]   ;;  %s205_s12 = sshll.u32 %s465_s3, 4  ;;  %s206_s12 = int_to_ptr.hbm [resolvable:$true] %s205_s12 }
  0x13   :  { %238 = vmatmul.msk.f32.vlgmr.msra.gmra.mxu0 %vm71_vm0, %v67_v3  ;;  %s203_s9 = sshll.u32 %s392_s8, 4  ;;  %s204_s9 = int_to_ptr.vmem [resolvable:$true] %s203_s9 }
  0x14   :  { %240 = vmatmul.msk.f32.vlgmr.msra.gmra.mxu1 %vm71_vm0, %v68_v5 }
  0x90   :  { %v95_v6 = vpop.f32.mrf.mxu0 }
  0x91   :  { %v127_v7 = vsel %vm126_vm1, %v95_v6, -inf  ;;  %v121_v8 = vpop.f32.mrf.mxu1 }
  0x92   :  { %128 = vmax.xlane.f32.xlu0 %v127_v7  ;;  %v130_v9 = vsel %vm126_vm1, %v121_v8, -inf }
  0x9a   :  { %131 = vmax.xlane.f32.xlu0 %v130_v9 }
 0x105   :  { %v129_v10 = vpop.xlane.xlu0 %128 }
 0x106   :  { %v133_v11 = vsub.f32 %v95_v6, %v129_v10 }
 0x108   :  { %v135_v12 = vmul.f32 1.442695, %v133_v11 }
 0x10a   :  { %250 = vpow2.f32 %v135_v12 }
 0x10d   :  { %v132_v13 = vpop.xlane.xlu0 %131 }
 0x10e   :  { %v134_v14 = vsub.f32 %v121_v8, %v132_v13 }
 0x110   :  { %v251_v15 = vpop.eup %250  ;;  %v137_v16 = vmul.f32 1.442695, %v134_v14 }
 0x111   :  { %v139_v17 = vsel %vm126_vm1, %v251_v15, 0.0 }
 0x112   :  { %252 = vpow2.f32 %v137_v16  ;;  %140 = vadd.xlane.f32.xlu1 %v139_v17 }
 0x118   :  { %v253_v18 = vpop.eup %252 }
 0x119   :  { %v142_v19 = vsel %vm126_vm1, %v253_v18, 0.0 }
 0x11a   :  { %143 = vadd.xlane.f32.xlu1 %v142_v19 }
 0x185   :  { %v141_v22 = vpop.xlane.xlu1 %140 }
 0x186   :  { %254 = vrcp.f32 %v141_v22 }
 0x18c   :  { %v255_v23 = vpop.eup %254 }
 0x18d   :  { %v144_v24 = vpop.xlane.xlu1 %143  ;;  %v147_v25 = vmul.f32 %v255_v23, %v251_v15 }
 0x18e   :  { %256 = vrcp.f32 %v144_v24 }
 0x18f   :  { %241 = vmatmul.msk.f32.vlgmr.msra.gmra.mxu2 %vm126_vm1, %v147_v25  ;;  %149 = vst.msk [vmem:[#allocation9] sm:$0xff] %vm126_vm1, %v147_v25 }
 0x194   :  { %v257_v26 = vpop.eup %256 }
 0x195   :  { %v148_v27 = vmul.f32 %v257_v26, %v253_v18 }
 0x197   :  { %242 = vmatmul.msk.f32.vlgmr.msra.gmra.mxu3 %vm126_vm1, %v148_v27  ;;  %150 = vst.msk [vmem:[#allocation9 + $0x8] sm:$0xff] %vm126_vm1, %v148_v27 }
 0x198   :  { %224 = dma.vmem_to_hbm [thread:$0]  %s217_s30, 256, %s219_s7, [#allocation10], %s387_s23, %s387_s23, %s388_s24  }
 0x212   :  { %v171_v28 = vpop.f32.mrf.mxu2 }
 0x213   :  { %197 = vst.msk [vmem:[#allocation8] sm:$0xff] %vm71_vm0, %v171_v28 }
 0x21a   :  { %v194_v29 = vpop.f32.mrf.mxu3 }
 0x21b   :  { %198 = vst.msk [vmem:[#allocation8 + $0x8] sm:$0xff] %vm71_vm0, %v194_v29 }
 0x21c   :  { %211 = dma.vmem_to_hbm [thread:$0]  %s204_s9, 256, %s206_s12, [#allocation4], %s387_s23, %s387_s23, %s388_s24  }
 0x21d   :  { %382 = dma.done.wait [#allocation4], 256  }
 0x21e   :  { %383 = vsyncadd [#allocation4], 4294967040 }
 0x21f   :  { %384 = dma.done.wait [#allocation10], 256  }
 0x220   :  { %385 = vsyncadd [#allocation10], 4294967040 }
 0x221   :  { %233 = vsyncpa [#allocation3], 1 }
 0x222   :  { %234 = vsyncpa [#allocation6], 1 }
 0x223   :  { %235 = vsyncpa [#allocation4], 1 }
 0x224   :  { %236 = vsyncpa [#allocation10], 1 }

</bundles_post_ra>
